<compile_context>
chip_gen: v6e
topology: v6e:2x2x1
jax: 0.10.0
libtpu: 0.0.40
codegen_flags: <defaults>
</compile_context>

<pallas_src>
import jax
import jax.numpy as jnp
from jax.experimental import pallas as pl
from jax.experimental.pallas import tpu as pltpu

LANE = 128
# ~4 MiB per block: in + out, double-buffered => ~16 MiB VMEM, covered by the
# explicit vmem_limit_bytes below on every generation (v5e/v6e: 128 MiB
# physical VMEM, v7x: 64 MiB physical -> 32 MiB limit leaves headroom).
TARGET_BLOCK_BYTES = 4 * 1024 * 1024
VMEM_LIMIT_BYTES = 32 * 1024 * 1024
# Keep the grid length >= MIN_GRID when the input allows it so (a) the DMA
# pipeline has work to overlap even for inputs that fit a single block, and
# (b) v7x can shard the "parallel" axis across its 2 TensorCores.
MIN_GRID = 4


def _scale_kernel(scale_ref, x_ref, o_ref):
    # scale is a (1,1) f32 in SMEM (matches the FloatTensor buffer semantics);
    # multiply with the f32 scale and cast the result back to the input dtype.
    s = scale_ref[0, 0]
    o_ref[...] = (x_ref[...] * s).astype(o_ref.dtype)


def _choose_lanes(n: int):
    """Widest lane count (multiple of 128) that divides n exactly, else None."""
    for w in (2048, 1024, 512, 256, 128):
        if n % w == 0:
            return w
    return None


def scale_layer(x: jax.Array, scale) -> jax.Array:
    """Equivalent of ScaleLayer.forward: x * scale (scale is an f32 buffer)."""
    orig_shape = x.shape
    dtype = x.dtype
    itemsize = jnp.dtype(dtype).itemsize
    n = x.size
    scale_arr = jnp.asarray(scale, dtype=jnp.float32).reshape(1, 1)

    lanes = _choose_lanes(n)
    if lanes is None or n == 0:
        # Ragged fallback: a pad -> kernel -> slice path would do ~3x the HBM
        # traffic of this mem-bound op, so let XLA do a single fused pass.
        return (x.astype(jnp.float32) * scale_arr[0, 0]).astype(dtype).reshape(orig_shape)

    x2d = x.reshape(-1, lanes)  # metadata-only reshape, no extra HBM pass
    rows = x2d.shape[0]

    # Dtype-aware sublane granularity: 8 (f32), 16 (bf16/f16), 32 (int8/fp8).
    min_sub = max(8, 32 // itemsize)
    block_rows = max(min_sub,
                     (TARGET_BLOCK_BYTES // (lanes * itemsize)) // min_sub * min_sub)
    # Grid-length floor: split inputs that would fit one block so the pipeline
    # (and megacore sharding on v7x) has >= MIN_GRID steps whenever possible.
    split_cap = max(min_sub, (rows // MIN_GRID) // min_sub * min_sub)
    block_rows = min(block_rows, split_cap)
    if block_rows >= rows:
        block_rows = rows  # full-extent block is always a legal block shape
    grid = (pl.cdiv(rows, block_rows),)  # partial last block masked by Pallas

    out2d = pl.pallas_call(
        _scale_kernel,
        out_shape=jax.ShapeDtypeStruct((rows, lanes), dtype),
        grid=grid,
        in_specs=[
            pl.BlockSpec(memory_space=pltpu.MemorySpace.SMEM),   # scale scalar
            pl.BlockSpec((block_rows, lanes), lambda i: (i, 0)),  # input tile
        ],
        out_specs=pl.BlockSpec((block_rows, lanes), lambda i: (i, 0)),
        compiler_params=pltpu.CompilerParams(
            dimension_semantics=("parallel",),
            vmem_limit_bytes=VMEM_LIMIT_BYTES),
        cost_estimate=pl.CostEstimate(
            flops=n, transcendentals=0, bytes_accessed=2 * n * itemsize),
    )(scale_arr, x2d)

    return out2d.reshape(orig_shape)


if __name__ == "__main__":
    key = jax.random.PRNGKey(0)
    scale = 0.1  # "buffer" value set at construction time

    # Small NCHW-like input consistent with typical use of ScaleLayer.
    x = jax.random.normal(key, (2, 4, 16, 16), dtype=jnp.float32)
    out = jax.block_until_ready(scale_layer(x, scale))
    ref = x * jnp.float32(scale)
    assert out.shape == x.shape and out.dtype == x.dtype
    assert jnp.allclose(out, ref, atol=1e-6, rtol=1e-6)

    # Slightly larger input that exercises a multi-step grid (pipelined path).
    x_big = jax.random.normal(jax.random.PRNGKey(2), (2, 4, 64, 64), dtype=jnp.float32)
    out_big = jax.block_until_ready(scale_layer(x_big, scale))
    ref_big = x_big * jnp.float32(scale)
    assert out_big.shape == x_big.shape and out_big.dtype == x_big.dtype
    assert jnp.allclose(out_big, ref_big, atol=1e-6, rtol=1e-6)

    # Ragged path (element count not divisible by 128) -> single fused XLA pass.
    x_odd = jax.random.normal(jax.random.PRNGKey(1), (3, 5, 7), dtype=jnp.float32)
    out_odd = jax.block_until_ready(scale_layer(x_odd, scale))
    ref_odd = x_odd * jnp.float32(scale)
    assert out_odd.shape == x_odd.shape and out_odd.dtype == x_odd.dtype
    assert jnp.allclose(out_odd, ref_odd, atol=1e-6, rtol=1e-6)

    print("KERNEL_OK")
</pallas_src>

<mosaic_0001>
module attributes {stable_mosaic.version = 11 : i64} {
  func.func @_scale_kernel(%arg0: i32, %arg1: memref<1x1xf32, #tpu.memory_space<smem>>, %arg2: memref<1x2048xf32, #tpu.memory_space<vmem>>, %arg3: memref<1x2048xf32, #tpu.memory_space<vmem>>) attributes {dimension_semantics = [#tpu.dimension_semantics<parallel>], iteration_bounds = array<i64: 1>, scalar_prefetch = 0 : i64, scratch_operands = 0 : i64, tpu.core_type = #tpu.core_type<tc>, window_params = [{transform_indices = @transform_0, window_bounds = array<i64: 1, 1>}, {transform_indices = @transform_1, window_bounds = array<i64: 1, 2048>}, {transform_indices = @transform_2, window_bounds = array<i64: 1, 2048>}]} {
    %c0 = arith.constant 0 : index
    %c0_0 = arith.constant 0 : index
    %0 = memref.load %arg1[%c0, %c0_0] : memref<1x1xf32, #tpu.memory_space<smem>>
    %c0_1 = arith.constant 0 : index
    %c0_2 = arith.constant 0 : index
    %1 = vector.load %arg2[%c0_1, %c0_2] : memref<1x2048xf32, #tpu.memory_space<vmem>>, vector<1x2048xf32>
    %2 = vector.broadcast %0 : f32 to vector<1x2048xf32>
    %3 = arith.mulf %1, %2 : vector<1x2048xf32>
    %c0_3 = arith.constant 0 : index
    %c0_4 = arith.constant 0 : index
    %4 = vector.load %arg3[%c0_3, %c0_4] : memref<1x2048xf32, #tpu.memory_space<vmem>>, vector<1x2048xf32>
    tpu.vector_store %arg3[%c0_3, %c0_4], %3 {strides = array<i32>} : memref<1x2048xf32, #tpu.memory_space<vmem>>, vector<1x2048xf32>,
    return
  }
  func.func @transform_0(%arg0: i32) -> (i32, i32) {
    %c0_i32 = arith.constant 0 : i32
    %c0_i32_0 = arith.constant 0 : i32
    %c0_i32_1 = arith.constant 0 : i32
    return %c0_i32, %c0_i32_0 : i32, i32
  }
  func.func @transform_1(%arg0: i32) -> (i32, i32) {
    %c0_i32 = arith.constant 0 : i32
    %c0_i32_0 = arith.constant 0 : i32
    return %arg0, %c0_i32 : i32, i32
  }
  func.func @transform_2(%arg0: i32) -> (i32, i32) {
    %c0_i32 = arith.constant 0 : i32
    %c0_i32_0 = arith.constant 0 : i32
    return %arg0, %c0_i32 : i32, i32
  }
}

</mosaic_0001>

<bundles_post_ra>
// kernel: tpu_custom_call.1
= control target key start
LH: loop header
LB: loop body
LE: loop exit
PB: predicated region body
PF: predicated region fallthrough
CT: control target
= control target key end

     0   :  { %8 = vsyncpa [#allocation4], 0  ;;  %s120_s0 = inlined_call_operand.<no memory space> [shape: f32[1,1], index: 0, kind: input, shape index: {}]   ;;  %s121_s1 = inlined_call_operand.hbm [shape: f32[1,2048], index: 1, kind: input, shape index: {}]   ;;  %s122_s2 = inlined_call_operand.hbm [shape: f32[1,2048], index: 2, kind: output, shape index: {}]  }
   0x1   :  { %9 = vsyncpa [#allocation5], 0  ;;  %s94_s9 = smov [#allocation3]  }
   0x2   :  { %s18_s10 = sshll.u32 %s94_s9, 4  ;;  %s19_s10 = int_to_ptr.vmem [resolvable:$true] %s18_s10 }
   0x3   :  { %s58_s11 = scalar_lea.vmem %s19_s10, 256  ;;  %p63_p1 = scmp.lt.s32.totalorder %s19_s10, %s19_s10 }
   0x4   :  { %p59_p0 = scmp.ne.s32.totalorder %s19_s10, %s58_s11  ;;  %p64_p2 = scmp.lt.s32.totalorder %s58_s11, %s58_s11 }
   0x6   :  { %p65_p3 = por %p64_p2, %p63_p1 }
   0x8   :  { %p66_p4 = pnand %p65_p3, %p59_p0 }
   0xa   :  { %69 = shalt.err (!%p66_p4)
}
   0xb   :  { %21 = dma.hbm_to_vmem [thread:$0]  %s121_s1, 256, %s19_s10, [#allocation4]  }
   0xc   :  { %90 = dma.done.wait [#allocation4], 256  }
   0xd   :  { %91 = vsyncadd [#allocation4], 4294967040  ;;  %v28_v0 = vstv %s120_s0  ;;  %s95_s16 = smov [#allocation6]   ;;  %v26_v1 = vld [vmem:[#allocation3] sm:$0xff]  ;;  %v27_v2 = vld [vmem:[#allocation3 + $0x8] sm:$0xff] }
   0xe   :  { %s39_s17 = sshll.u32 %s95_s16, 4  ;;  %v29_v3 = vmul.f32 %v28_v0, %v26_v1  ;;  %v30_v4 = vmul.f32 %v28_v0, %v27_v2  ;;  %s40_s17 = int_to_ptr.vmem [resolvable:$true] %s39_s17 }
   0xf   :  { %s70_s18 = scalar_lea.vmem %s40_s17, 256  ;;  %p75_p6 = scmp.lt.s32.totalorder %s40_s17, %s40_s17 }
  0x10   :  { %31 = vst [vmem:[#allocation6] sm:$0xff] %v29_v3  ;;  %32 = vst [vmem:[#allocation6 + $0x8] sm:$0xff] %v30_v4  ;;  %p71_p5 = scmp.ne.s32.totalorder %s40_s17, %s70_s18  ;;  %p76_p7 = scmp.lt.s32.totalorder %s70_s18, %s70_s18 }
  0x12   :  { %p77_p8 = por %p76_p7, %p75_p6 }
  0x14   :  { %p78_p9 = pnand %p77_p8, %p71_p5 }
  0x16   :  { %81 = shalt.err (!%p78_p9)
}
  0x17   :  { %42 = dma.vmem_to_hbm [thread:$0]  %s40_s17, 256, %s122_s2, [#allocation5]  }
  0x18   :  { %92 = dma.done.wait [#allocation5], 256  }
  0x19   :  { %93 = vsyncadd [#allocation5], 4294967040 }
  0x1a   :  { %46 = vsyncpa [#allocation4], 1 }
  0x1b   :  { %47 = vsyncpa [#allocation5], 1 }

</bundles_post_ra>
